<compile_context>
chip_gen: v5e
topology: v5e:2x2
jax: 0.10.0
libtpu: 0.0.40
codegen_flags: <defaults>
</compile_context>

<pallas_src>
import functools

import jax
import jax.numpy as jnp
from jax.experimental import pallas as pl
from jax.experimental.pallas import tpu as pltpu


def _round_up(x, m):
    return ((x + m - 1) // m) * m


# ---------------------------------------------------------------------------
# Phase 1: per-batch sufficient statistics (sum, sum of squares) of the conv
# output, accumulated across the L-tile grid axis into a resident output block.
# ---------------------------------------------------------------------------
def _stats_kernel(xpe_ref, w_ref, out_ref, *, tp, lc):
    # xpe_ref: (R, C)   padded input; conv position p uses rows p+1, p+2, p+3
    # w_ref:   (3C, C)  im2col conv weight
    # out_ref: (2, C)   [sum; sum_sq] per-batch accumulator (revisited over l)
    l = pl.program_id(1)
    b0 = pl.multiple_of(l * tp, 16)
    x0 = xpe_ref[pl.ds(b0 + 1, tp), :]
    x1 = xpe_ref[pl.ds(b0 + 2, tp), :]
    x2 = xpe_ref[pl.ds(b0 + 3, tp), :]
    xcol = jnp.concatenate([x0, x1, x2], axis=-1)                 # (tp, 3C)
    y = jnp.dot(xcol, w_ref[...], preferred_element_type=jnp.float32)
    rid = jax.lax.broadcasted_iota(jnp.int32, (tp, 1), 0)
    y = jnp.where(l * tp + rid < lc, y, 0.0)                      # mask pad rows
    part = jnp.concatenate([jnp.sum(y, axis=0, keepdims=True),
                            jnp.sum(y * y, axis=0, keepdims=True)], axis=0)

    @pl.when(l == 0)
    def _():
        out_ref[...] = jnp.zeros_like(out_ref)

    out_ref[...] += part


# ---------------------------------------------------------------------------
# Phase 2: conv -> fused BatchNorm (scale/shift) -> ELU -> MaxPool(k=3, s=2).
# Output row t of tile l is pooled output o = l*tlo + t, which maxes conv
# positions 2o-1, 2o, 2o+1 = local conv rows 2t, 2t+1, 2t+2 of this tile.
# ---------------------------------------------------------------------------
def _apply_kernel(xpe_ref, w_ref, scale_ref, shift_ref, out_ref, *, tlo):
    l = pl.program_id(1)
    nr = 2 * tlo + 1                                              # conv rows / tile
    b0 = pl.multiple_of(2 * tlo * l, 16)
    x0 = xpe_ref[pl.ds(b0, nr), :]
    x1 = xpe_ref[pl.ds(b0 + 1, nr), :]
    x2 = xpe_ref[pl.ds(b0 + 2, nr), :]
    xcol = jnp.concatenate([x0, x1, x2], axis=-1)                 # (nr, 3C)
    y = jnp.dot(xcol, w_ref[...], preferred_element_type=jnp.float32)
    y = y * scale_ref[...] + shift_ref[...]                       # fused BatchNorm
    y = jnp.where(y > 0, y, jnp.exp(y) - 1.0)                     # ELU (alpha=1)
    # Local row 0 of tile 0 is the fake conv position -1 (maxpool left padding):
    # mask it AFTER the ELU so it acts as -inf in the pooling max.
    rid = jax.lax.broadcasted_iota(jnp.int32, (nr, 1), 0)
    y = jnp.where(jnp.logical_and(l == 0, rid == 0), -1e30, y)
    m = jnp.maximum(y[0:2 * tlo], y[1:2 * tlo + 1])               # m[j] = max(y[j], y[j+1])
    out = jnp.max(m.reshape(tlo, 2, -1), axis=1)                  # max(y[2t],y[2t+1],y[2t+2])
    out_ref[...] = out.astype(out_ref.dtype)


def conv_layer_forward(x, w, b, gamma, beta, *, eps=1e-5, tile_lo=64,
                       compute_dtype=jnp.bfloat16,
                       vmem_limit_bytes=48 * 1024 * 1024):
    """ConvLayer forward.  x: (B, L, C); w: (C_out, C_in, 3) PyTorch layout.

    The Conv1d bias `b` is accepted but unused: training-mode BatchNorm subtracts
    the per-channel mean immediately after the conv, so a constant per-channel
    bias cancels exactly.
    """
    del b
    B, L, C = x.shape
    assert L % 2 == 0, "even sequence length assumed (matches Informer usage)"
    Lc = L + 2                       # conv output length
    Lo = Lc // 2                     # pooled output length

    # pooled-output rows per L tile (multiple of 8 for the output BlockSpec)
    tlo = _round_up(min(max(tile_lo, 8), _round_up(Lo, 8)), 8)
    nlt = pl.cdiv(Lo, tlo)
    lo_pad = nlt * tlo
    tp = 2 * tlo                     # conv rows per tile in the stats pass
    R = _round_up(2 * lo_pad + 3, 8)

    # circular pad by 2 (padding_mode='circular'), one leading dummy row (fake
    # conv position -1, masked in-kernel), zero right-pad up to R rows.
    xp = jnp.concatenate([x[:, L - 2:, :], x, x[:, :2, :]], axis=1)   # (B, L+4, C)
    xpe = jnp.concatenate(
        [jnp.zeros((B, 1, C), x.dtype), xp,
         jnp.zeros((B, R - (L + 5), C), x.dtype)], axis=1).astype(compute_dtype)

    # (C_out, C_in, 3) -> (3*C_in, C_out) for the single im2col matmul.
    w_col = jnp.transpose(w, (2, 1, 0)).reshape(3 * C, C).astype(compute_dtype)

    grid = (B, nlt)
    xpe_spec = pl.BlockSpec((None, R, C), lambda bi, li: (bi, 0, 0))
    w_spec = pl.BlockSpec((3 * C, C), lambda bi, li: (0, 0))

    # ---- phase 1: per-batch sum / sum-of-squares of the conv output ---------
    stats = pl.pallas_call(
        functools.partial(_stats_kernel, tp=tp, lc=Lc),
        out_shape=jax.ShapeDtypeStruct((B, 2, C), jnp.float32),
        grid=grid,
        in_specs=[xpe_spec, w_spec],
        out_specs=pl.BlockSpec((None, 2, C), lambda bi, li: (bi, 0, 0)),
        compiler_params=pltpu.CompilerParams(
            dimension_semantics=("parallel", "arbitrary"),
            vmem_limit_bytes=vmem_limit_bytes),
    )(xpe, w_col)

    # ---- fold BatchNorm (training batch stats, biased variance) -------------
    tot = jnp.sum(stats, axis=0)                 # (2, C) -- tiny, plain JAX
    n = B * Lc
    mean = tot[0] / n
    var = jnp.maximum(tot[1] / n - mean * mean, 0.0)
    inv = jax.lax.rsqrt(var + eps)
    g32 = gamma.astype(jnp.float32)
    scale = (g32 * inv).reshape(1, C)
    shift = (beta.astype(jnp.float32) - mean * g32 * inv).reshape(1, C)

    # ---- phase 2: conv -> BN -> ELU -> maxpool -------------------------------
    out = pl.pallas_call(
        functools.partial(_apply_kernel, tlo=tlo),
        out_shape=jax.ShapeDtypeStruct((B, lo_pad, C), jnp.float32),
        grid=grid,
        in_specs=[xpe_spec, w_spec,
                  pl.BlockSpec((1, C), lambda bi, li: (0, 0)),
                  pl.BlockSpec((1, C), lambda bi, li: (0, 0))],
        out_specs=pl.BlockSpec((None, tlo, C), lambda bi, li: (bi, li, 0)),
        compiler_params=pltpu.CompilerParams(
            dimension_semantics=("parallel", "parallel"),
            vmem_limit_bytes=vmem_limit_bytes),
    )(xpe, w_col, scale, shift)

    return out[:, :Lo, :]


def reference_forward(x, w, b, gamma, beta):
    """Independent pure-JAX reference mirroring the PyTorch forward."""
    xt = jnp.transpose(x, (0, 2, 1))                               # (B, C, L)
    xp = jnp.concatenate([xt[:, :, -2:], xt, xt[:, :, :2]], axis=-1)
    y = jax.lax.conv_general_dilated(
        xp, w, window_strides=(1,), padding="VALID",
        dimension_numbers=("NCH", "OIH", "NCH"))
    y = y + b[None, :, None]
    mean = jnp.mean(y, axis=(0, 2), keepdims=True)
    var = jnp.var(y, axis=(0, 2), keepdims=True)                   # biased
    y = (y - mean) / jnp.sqrt(var + 1e-5)
    y = y * gamma[None, :, None] + beta[None, :, None]
    y = jnp.where(y > 0, y, jnp.exp(y) - 1.0)
    y = jnp.pad(y, ((0, 0), (0, 0), (1, 1)), constant_values=-jnp.inf)
    y = jax.lax.reduce_window(y, -jnp.inf, jax.lax.max,
                              (1, 1, 3), (1, 1, 2), "VALID")
    return jnp.transpose(y, (0, 2, 1))


if __name__ == "__main__":
    key = jax.random.PRNGKey(0)
    # C = 128 keeps the lane (last) dim dense; small shapes overall.
    B, L, C = 2, 32, 128
    k1, k2, k3 = jax.random.split(key, 3)

    x = jax.random.normal(k1, (B, L, C), jnp.float32)

    # PyTorch-like init: Conv1d uniform(-1/sqrt(fan_in), ..), BN weight=1 bias=0.
    fan_in = C * 3
    bound = 1.0 / (fan_in ** 0.5)
    w = jax.random.uniform(k2, (C, C, 3), jnp.float32, -bound, bound)  # (Cout, Cin, K)
    b = jax.random.uniform(k3, (C,), jnp.float32, -bound, bound)
    gamma = jnp.ones((C,), jnp.float32)
    beta = jnp.zeros((C,), jnp.float32)

    ref = jax.block_until_ready(reference_forward(x, w, b, gamma, beta))
    Lo = (L + 2) // 2

    # f32 compute path, small L tiles -> exercises the multi-tile grid and the
    # cross-tile stats accumulation; tight tolerance vs the f32 reference.
    out_f32 = jax.block_until_ready(
        conv_layer_forward(x, w, b, gamma, beta,
                           tile_lo=8, compute_dtype=jnp.float32))
    assert out_f32.shape == (B, Lo, C), out_f32.shape
    assert jnp.allclose(out_f32, ref, atol=2e-3, rtol=2e-3), \
        float(jnp.max(jnp.abs(out_f32 - ref)))

    # default (bf16 MXU inputs, larger tile): looser tolerance per bf16 rounding.
    out_bf16 = jax.block_until_ready(
        conv_layer_forward(x, w, b, gamma, beta))
    assert out_bf16.shape == (B, Lo, C), out_bf16.shape
    assert jnp.allclose(out_bf16, ref, atol=1e-1, rtol=1e-1), \
        float(jnp.max(jnp.abs(out_bf16 - ref)))

    print("KERNEL_OK")
</pallas_src>

<mosaic_0001>
module attributes {stable_mosaic.version = 11 : i64} {
  func.func @_stats_kernel(%arg0: i32, %arg1: i32, %arg2: memref<1x56x128xf32, #tpu.memory_space<vmem>>, %arg3: memref<384x128xf32, #tpu.memory_space<vmem>>, %arg4: memref<1x2x128xf32, #tpu.memory_space<vmem>>) attributes {dimension_semantics = [#tpu.dimension_semantics<parallel>, #tpu.dimension_semantics<arbitrary>], iteration_bounds = array<i64: 2, 3>, scalar_prefetch = 0 : i64, scratch_operands = 0 : i64, tpu.core_type = #tpu.core_type<tc>, window_params = [{transform_indices = @transform_0, window_bounds = array<i64: 1, 56, 128>}, {pipeline_mode = #tpu.pipeline_mode<synchronous>, transform_indices = @transform_1, window_bounds = array<i64: 384, 128>}, {transform_indices = @transform_2, window_bounds = array<i64: 1, 2, 128>}]} {
    %c16_i32 = arith.constant 16 : i32
    %0 = arith.muli %arg1, %c16_i32 : i32
    %1 = tpu.assume_multiple %0, 16 : i32
    %c1_i32 = arith.constant 1 : i32
    %2 = arith.addi %1, %c1_i32 : i32
    %c0 = arith.constant 0 : index
    %3 = arith.index_cast %2 : i32 to index
    %c0_0 = arith.constant 0 : index
    %4 = vector.load %arg2[%c0, %3, %c0_0] : memref<1x56x128xf32, #tpu.memory_space<vmem>>, vector<1x16x128xf32>
    %5 = vector.shape_cast %4 : vector<1x16x128xf32> to vector<16x128xf32>
    %c2_i32 = arith.constant 2 : i32
    %6 = arith.addi %1, %c2_i32 : i32
    %c0_1 = arith.constant 0 : index
    %7 = arith.index_cast %6 : i32 to index
    %c0_2 = arith.constant 0 : index
    %8 = vector.load %arg2[%c0_1, %7, %c0_2] : memref<1x56x128xf32, #tpu.memory_space<vmem>>, vector<1x16x128xf32>
    %9 = vector.shape_cast %8 : vector<1x16x128xf32> to vector<16x128xf32>
    %c3_i32 = arith.constant 3 : i32
    %10 = arith.addi %1, %c3_i32 : i32
    %c0_3 = arith.constant 0 : index
    %11 = arith.index_cast %10 : i32 to index
    %c0_4 = arith.constant 0 : index
    %12 = vector.load %arg2[%c0_3, %11, %c0_4] : memref<1x56x128xf32, #tpu.memory_space<vmem>>, vector<1x16x128xf32>
    %13 = vector.shape_cast %12 : vector<1x16x128xf32> to vector<16x128xf32>
    %14 = tpu.concatenate %5, %9, %13 in 1 : vector<16x128xf32>, vector<16x128xf32>, vector<16x128xf32> -> vector<16x384xf32>
    %c0_5 = arith.constant 0 : index
    %c0_6 = arith.constant 0 : index
    %15 = vector.load %arg3[%c0_5, %c0_6] : memref<384x128xf32, #tpu.memory_space<vmem>>, vector<384x128xf32>
    %cst = arith.constant dense<0.000000e+00> : vector<16x128xf32>
    %16 = tpu.matmul %14, %15, %cst {dimension_numbers = #tpu.dot_dimension_numbers<[1], [0], [0], [1], [0, 0, 1, 1], [], []>} : vector<16x384xf32>, vector<384x128xf32>, vector<16x128xf32> -> vector<16x128xf32>
    %17 = tpu.iota {dimensions = array<i32: 0>} : vector<16x1xi32>
    %c16_i32_7 = arith.constant 16 : i32
    %18 = arith.muli %arg1, %c16_i32_7 : i32
    %19 = vector.broadcast %18 : i32 to vector<16x1xi32>
    %20 = arith.addi %19, %17 : vector<16x1xi32>
    %c34_i32 = arith.constant 34 : i32
    %21 = vector.broadcast %c34_i32 : i32 to vector<16x1xi32>
    %22 = arith.cmpi slt, %20, %21 : vector<16x1xi32>
    %cst_8 = arith.constant 0.000000e+00 : f32
    %23 = vector.shape_cast %22 : vector<16x1xi1> to vector<16x1xi1>
    %24 = vector.broadcast %23 : vector<16x1xi1> to vector<16x128xi1>
    %25 = vector.broadcast %cst_8 : f32 to vector<16x128xf32>
    %26 = arith.select %24, %16, %25 : vector<16x128xi1>, vector<16x128xf32>
    %cst_9 = arith.constant dense<0.000000e+00> : vector<128xf32>
    %27 = vector.multi_reduction <add>, %26, %cst_9 [0] : vector<16x128xf32> to vector<128xf32>
    %28 = vector.shape_cast %27 : vector<128xf32> to vector<1x128xf32>
    %29 = arith.mulf %26, %26 : vector<16x128xf32>
    %cst_10 = arith.constant dense<0.000000e+00> : vector<128xf32>
    %30 = vector.multi_reduction <add>, %29, %cst_10 [0] : vector<16x128xf32> to vector<128xf32>
    %31 = vector.shape_cast %30 : vector<128xf32> to vector<1x128xf32>
    %32 = tpu.concatenate %28, %31 in 0 : vector<1x128xf32>, vector<1x128xf32> -> vector<2x128xf32>
    %c0_i32 = arith.constant 0 : i32
    %33 = arith.cmpi eq, %arg1, %c0_i32 : i32
    %34 = arith.extui %33 : i1 to i32
    %c0_i32_11 = arith.constant 0 : i32
    %35 = arith.cmpi ne, %34, %c0_i32_11 : i32
    scf.if %35 {
      %cst_18 = arith.constant 0.000000e+00 : f32
      %42 = vector.broadcast %cst_18 : f32 to vector<2x128xf32>
      %c0_19 = arith.constant 0 : index
      %c0_20 = arith.constant 0 : index
      %c0_21 = arith.constant 0 : index
      %43 = vector.load %arg4[%c0_19, %c0_20, %c0_21] : memref<1x2x128xf32, #tpu.memory_space<vmem>>, vector<1x2x128xf32>
      %44 = vector.shape_cast %43 : vector<1x2x128xf32> to vector<2x128xf32>
      %45 = vector.shape_cast %42 : vector<2x128xf32> to vector<1x2x128xf32>
      tpu.vector_store %arg4[%c0_19, %c0_20, %c0_21], %45 {strides = array<i32>} : memref<1x2x128xf32, #tpu.memory_space<vmem>>, vector<1x2x128xf32>,
    } else {
    }
    %c0_12 = arith.constant 0 : index
    %c0_13 = arith.constant 0 : index
    %c0_14 = arith.constant 0 : index
    %36 = vector.load %arg4[%c0_12, %c0_13, %c0_14] : memref<1x2x128xf32, #tpu.memory_space<vmem>>, vector<1x2x128xf32>
    %37 = vector.shape_cast %36 : vector<1x2x128xf32> to vector<2x128xf32>
    %38 = arith.addf %37, %32 : vector<2x128xf32>
    %c0_15 = arith.constant 0 : index
    %c0_16 = arith.constant 0 : index
    %c0_17 = arith.constant 0 : index
    %39 = vector.load %arg4[%c0_15, %c0_16, %c0_17] : memref<1x2x128xf32, #tpu.memory_space<vmem>>, vector<1x2x128xf32>
    %40 = vector.shape_cast %39 : vector<1x2x128xf32> to vector<2x128xf32>
    %41 = vector.shape_cast %38 : vector<2x128xf32> to vector<1x2x128xf32>
    tpu.vector_store %arg4[%c0_15, %c0_16, %c0_17], %41 {strides = array<i32>} : memref<1x2x128xf32, #tpu.memory_space<vmem>>, vector<1x2x128xf32>,
    return
  }
  func.func @transform_0(%arg0: i32, %arg1: i32) -> (i32, i32, i32) {
    %c0_i32 = arith.constant 0 : i32
    %c0_i32_0 = arith.constant 0 : i32
    %c0_i32_1 = arith.constant 0 : i32
    return %arg0, %c0_i32, %c0_i32_0 : i32, i32, i32
  }
  func.func @transform_1(%arg0: i32, %arg1: i32) -> (i32, i32) {
    %c0_i32 = arith.constant 0 : i32
    %c0_i32_0 = arith.constant 0 : i32
    %c0_i32_1 = arith.constant 0 : i32
    return %c0_i32, %c0_i32_0 : i32, i32
  }
  func.func @transform_2(%arg0: i32, %arg1: i32) -> (i32, i32, i32) {
    %c0_i32 = arith.constant 0 : i32
    %c0_i32_0 = arith.constant 0 : i32
    %c0_i32_1 = arith.constant 0 : i32
    return %arg0, %c0_i32, %c0_i32_0 : i32, i32, i32
  }
}

</mosaic_0001>

<bundles_post_ra>
// kernel: tpu_custom_call.1
= control target key start
LH: loop header
LB: loop body
LE: loop exit
PB: predicated region body
PF: predicated region fallthrough
CT: control target
= control target key end

     0   :  { %s984_s0 = inlined_call_operand.hbm [shape: f32[2,56,128], index: 0, kind: input, shape index: {}]   ;;  %s985_s1 = inlined_call_operand.hbm [shape: f32[384,128], index: 1, kind: input, shape index: {}]   ;;  %s986_s2 = inlined_call_operand.hbm [shape: f32[2,2,128], index: 2, kind: output, shape index: {}]  }
   0x1   :  { %990 = sst [smem:[#allocation13_spill]] %s985_s1 }
   0x2   :  { %7 = vsyncpa [#allocation3], 0 }
   0x3   :  { %9 = vsyncpa [#allocation3 + $0x1], 0 }
   0x4   :  { %10 = vsyncpa [#allocation6], 0 }
   0x5   :  { %11 = vsyncpa [#allocation4], 0 }
   0x6   :  { %13 = vsyncpa [#allocation4 + $0x1], 0  ;;  %s797_s9 = smov 0   ;;  %s799_s10 = smov 0  }
   0x7   :  { %s801_s11 = smov 0   ;;  %s803_s12 = smov 0  }
   0x8   :  { %s805_s13 = smov 0   ;;  %s807_s14 = smov 0  }
   0x9   :  { %s809_s15 = smov 0   ;;  %s811_s16 = smov 0  }
   0xa LB: > { %991 = sst [smem:[#allocation11_spill]] %s768_s14  ;;  %s479_s17 = sadd.s32 4294967295, %s776_s16   ;;  %s776_s16 = sphi %s811_s16, %s19_s16   ;;  %s772_s15 = sphi %s809_s15, %s1009_s15   ;;  %s768_s14 = sphi %s807_s14, %s1004_s14   ;;  %s764_s13 = sphi %s805_s13, %s1008_s13   ;;  %s760_s12 = sphi %s803_s12, %s1003_s12   ;;  %s756_s11 = sphi %s801_s11, %s1007_s11   ;;  %s752_s10 = sphi %s799_s10, %s1006_s10   ;;  %s748_s9 = sphi %s797_s9, %s1005_s9  }
   0xb   : > { %s480_s18 = sadd.s32 4294967294, %s776_s16   ;;  %p51_p0 = scmp.ne.s32.totalorder %s752_s10, %s748_s9 }
   0xc   : > { %p841_p1 = scmp.eq.s32.totalorder %s479_s17, 0  ;;  %p845_p2 = scmp.eq.s32.totalorder %s479_s17, 5 }
   0xd   : > { %p102_p3 = scmp.eq.s32.totalorder %s480_s18, 5  ;;  %p481_p5 = scmp.ge.s32.totalorder %s776_s16, 1 }
   0xe   : > { %p851_p4 = por %p841_p1, %p51_p0  ;;  %p109_p7 = scmp.lt.s32.totalorder %s776_s16, 7 }
   0xf   : > { %p856_p6 = por %p102_p3, %p51_p0  ;;  %s996_s1 = sld [smem:[#allocation13_spill]] }
  0x10   : > { %p864_p8 = pnand %p481_p5, %p109_p7  ;;  %s778_s27 = smov [#allocation5]  }
  0x11   : > { %s122_s28 = sshll.u32 %s778_s27, 4  ;;  %s987_s29 = smov 128   ;;  %s123_s28 = int_to_ptr.vmem [resolvable:$true] %s122_s28 }
  0x12   : > { %p530_p9 = pneg %p864_p8  ;;  %s988_s30 = smov 8  }
  0x13   : > { %s28_s3 = sadd.s32 1, %s768_s14  ;;  %s31_s4 = sadd.s32 1, %s772_s15 }
  0x14   : > { %p531_p10 = pnand %p530_p9, %p841_p1  ;;  %p29_p11 = scmp.ge.s32.totalorder %s28_s3, 3 }
  0x15   : > { %s120_s25 = sshll.u32 %s996_s1, 4  ;;  %s38_s5 = sadd.s32 1, %s756_s11  ;;  %s121_s25 = int_to_ptr.hbm [resolvable:$true] %s120_s25 }
  0x16   : > { %533 = dma.hbm_to_vmem [thread:$0]  (!%p531_p10), %s121_s25, 6144, %s123_s28, [#allocation6], %s987_s29, %s987_s29, %s988_s30  }
  0x17   : > { %p45_p12 = scmp.ne.s32.totalorder %s756_s11, %s752_s10  ;;  %s1011_s3 = smov (%p29_p11, %s28_s3), 0 }
  0x18   : > { %998 = sst [smem:[#allocation12_spill]] %s1011_s3  ;;  %s1013_s4 = smov (!%p29_p11, %s31_s4), %s772_s15 }
  0x19   : > { %p46_p13 = scmp.eq.s32.totalorder %s776_s16, 0  ;;  %p886_p0 = por %p845_p2, %p45_p12 }
  0x1a   : > { %p33_p3 = scmp.ge.s32.totalorder %s1013_s4, 2  ;;  %p543_p5 = scmp.lt.s32.totalorder %s776_s16, 6 }
  0x1b   : > { %p891_p7 = por %p46_p13, %p45_p12  ;;  %s136_s8 = sand.u32 1, %s756_s11  }
  0x1c   : > { %s1015_s4 = smov (%p33_p3, %s1013_s4), 0  ;;  %s519_s17 = smul.u32 56, %s136_s8 }
  0x1d   : > { %s35_s18 = ssub.s32 %s772_s15, %s1015_s4  ;;  %s520_s23 = smul.u32 56, %s772_s15 }
  0x1e   : > { %p36_p9 = scmp.eq.s32.totalorder %s35_s18, 0  ;;  %s140_s27 = scalar_lea.vmem [#allocation2], %s519_s17 }
  0x1f   : > { %s145_s25 = scalar_lea.hbm %s984_s0, %s520_s23  ;;  %s148_s28 = sshll.u32 %s140_s27, 4  ;;  %s149_s28 = int_to_ptr.vmem [resolvable:$true] %s148_s28 }
  0x20   : > { %s905_s29 = scalar_select %p36_p9, %s756_s11, %s38_s5  }
  0x21   : > { %s146_s30 = sshll.u32 %s145_s25, 4  ;;  %p535_p2 = pnand %p543_p5, %p891_p7  ;;  %s147_s30 = int_to_ptr.hbm [resolvable:$true] %s146_s30 }
  0x22   : > { %s137_s1 = scalar_lea.sflag [#allocation3], %s136_s8  ;;  %s1001_s3 = smov 8  }
  0x23   : > { %s1002_s14 = smov 128   ;;  %160 = sbr.rel (%p864_p8) target bundleno = 253 (0xfd), region = 28 }
  0x24   : > { %537 = dma.hbm_to_vmem [thread:$0]  (!%p535_p2), %s147_s30, 896, %s149_s28, %s137_s1, %s1002_s14, %s1002_s14, %s1001_s3  }
  0x25   : > { %s917_s17 = sand.u32 (!%p864_p8), 1, %s752_s10  }
  0x26   : > { %s521_s5 = smul.u32 (!%p864_p8), 56, %s917_s17  ;;  %s163_s18 = scalar_lea.sflag (!%p864_p8), [#allocation3], %s917_s17 }
  0x28   : > { %s921_s23 = scalar_lea.vmem [#allocation2], %s521_s5 }
  0x29   : > { %735 = dma.done.wait (%p851_p4), %s163_s18, 896  }
  0x2a   : > { %737 = vsyncadd (%p851_p4), %s163_s18, 4294966400 }
  0x2b   : > { %739 = dma.done.wait (%p841_p1), [#allocation6], 6144  }
  0x2c   : > { %741 = vsyncadd (%p841_p1), [#allocation6], 4294961152  ;;  %s487_s1 = sshll.u32 %s917_s17, 1  ;;  %v253_v0 = vld [vmem:[#allocation5 + $0x178] sm:$0xff]  ;;  %v252_v1 = vld [vmem:[#allocation5 + $0x170] sm:$0xff]  ;;  %s488_s14 = sshll.u32 %s760_s12, 4  ;;  %v323_v54 = vlaneseq }
  0x2d   : > { %v221_v2 = vld [vmem:[#allocation5 + $0x78] sm:$0xff]  ;;  %300 = vmatpush.msra.mxu2 %v253_v0  ;;  %v220_v4 = vld [vmem:[#allocation5 + $0x70] sm:$0xff]  ;;  %v251_v5 = vld [vmem:[#allocation5 + $0x168] sm:$0xff]  ;;  %s419_s19 = scalar_lea.vmem %s921_s23, %s488_s14 [#allocation2]  ;;  %v326_v58 = vstv %s488_s14  ;;  %vm353_vm2 = vcmask 1040384   ;;  %s192_s21 = scalar_lea.vmem [#allocation7], %s487_s1 }
  0x2e   : > { %254 = vmatpush.msra.mxu0 %v221_v2  ;;  %v237_v3 = vld [vmem:[#allocation5 + $0xf8] sm:$0xff]  ;;  %503 = vmatpush.msra.mxu3 %v221_v2  ;;  %v236_v6 = vld [vmem:[#allocation5 + $0xf0] sm:$0xff]  ;;  %v219_v7 = vld [vmem:[#allocation5 + $0x68] sm:$0xff]  ;;  %v324_v57 = vshrl.u32 %v323_v54, 7  ;;  %p498_p1 = scmp.ne.s32.totalorder %s760_s12, 0 }
  0x2f   : > { %277 = vmatpush.msra.mxu1 %v237_v3  ;;  %301 = vmatpush.msra.mxu2 %v252_v1  ;;  %v235_v8 = vld [vmem:[#allocation5 + $0xe8] sm:$0xff]  ;;  %v250_v9 = vld [vmem:[#allocation5 + $0x160] sm:$0xff]  ;;  %v249_v12 = vld [vmem:[#allocation5 + $0x158] sm:$0xff] }
  0x30   : > { %255 = vmatpush.msra.mxu0 %v220_v4  ;;  %504 = vmatpush.msra.mxu3 %v220_v4  ;;  %v218_v10 = vld [vmem:[#allocation5 + $0x60] sm:$0xff]  ;;  %v217_v13 = vld [vmem:[#allocation5 + $0x58] sm:$0xff]  ;;  %v248_v15 = vld [vmem:[#allocation5 + $0x150] sm:$0xff]  ;;  %v325_v60 = vadd.s32 8, %v324_v57  ;;  %v327_v62 = vadd.s32 %v326_v58, %v324_v57 }
  0x31   : > { %278 = vmatpush.msra.mxu1 %v236_v6  ;;  %302 = vmatpush.msra.mxu2 %v251_v5  ;;  %v234_v11 = vld [vmem:[#allocation5 + $0xe0] sm:$0xff]  ;;  %v233_v14 = vld [vmem:[#allocation5 + $0xd8] sm:$0xff]  ;;  %v216_v16 = vld [vmem:[#allocation5 + $0x50] sm:$0xff] }
  0x32   : > { %256 = vmatpush.msra.mxu0 %v219_v7  ;;  %505 = vmatpush.msra.mxu3 %v219_v7  ;;  %v232_v17 = vld [vmem:[#allocation5 + $0xd0] sm:$0xff]  ;;  %v247_v18 = vld [vmem:[#allocation5 + $0x148] sm:$0xff]  ;;  %v246_v21 = vld [vmem:[#allocation5 + $0x140] sm:$0xff]  ;;  %v328_v1 = vadd.s32 %v326_v58, %v325_v60  ;;  %vm329_vm0 = vcmp.lt.s32.totalorder %v327_v62, 34 }
  0x33   : > { %279 = vmatpush.msra.mxu1 %v235_v8  ;;  %303 = vmatpush.msra.mxu2 %v250_v9  ;;  %v215_v19 = vld [vmem:[#allocation5 + $0x48] sm:$0xff]  ;;  %v214_v22 = vld [vmem:[#allocation5 + $0x40] sm:$0xff]  ;;  %v245_v24 = vld [vmem:[#allocation5 + $0x138] sm:$0xff] }
  0x34   : > { %257 = vmatpush.msra.mxu0 %v218_v10  ;;  %506 = vmatpush.msra.mxu3 %v218_v10  ;;  %v231_v20 = vld [vmem:[#allocation5 + $0xc8] sm:$0xff]  ;;  %v230_v23 = vld [vmem:[#allocation5 + $0xc0] sm:$0xff]  ;;  %v213_v25 = vld [vmem:[#allocation5 + $0x38] sm:$0xff]  ;;  %vm330_vm1 = vcmp.lt.s32.totalorder %v328_v1, 34 }
  0x35   : > { %280 = vmatpush.msra.mxu1 %v234_v11  ;;  %304 = vmatpush.msra.mxu2 %v249_v12  ;;  %v229_v26 = vld [vmem:[#allocation5 + $0xb8] sm:$0xff]  ;;  %v244_v27 = vld [vmem:[#allocation5 + $0x130] sm:$0xff]  ;;  %v243_v30 = vld [vmem:[#allocation5 + $0x128] sm:$0xff] }
  0x36   : > { %258 = vmatpush.msra.mxu0 %v217_v13  ;;  %507 = vmatpush.msra.mxu3 %v217_v13  ;;  %v212_v28 = vld [vmem:[#allocation5 + $0x30] sm:$0xff]  ;;  %v211_v31 = vld [vmem:[#allocation5 + $0x28] sm:$0xff]  ;;  %v242_v33 = vld [vmem:[#allocation5 + $0x120] sm:$0xff] }
  0x37   : > { %281 = vmatpush.msra.mxu1 %v233_v14  ;;  %305 = vmatpush.msra.mxu2 %v248_v15  ;;  %v228_v29 = vld [vmem:[#allocation5 + $0xb0] sm:$0xff]  ;;  %v227_v32 = vld [vmem:[#allocation5 + $0xa8] sm:$0xff]  ;;  %v210_v34 = vld [vmem:[#allocation5 + $0x20] sm:$0xff] }
  0x38   : > { %259 = vmatpush.msra.mxu0 %v216_v16  ;;  %508 = vmatpush.msra.mxu3 %v216_v16  ;;  %v226_v35 = vld [vmem:[#allocation5 + $0xa0] sm:$0xff]  ;;  %v241_v36 = vld [vmem:[#allocation5 + $0x118] sm:$0xff]  ;;  %v240_v39 = vld [vmem:[#allocation5 + $0x110] sm:$0xff] }
  0x39   : > { %282 = vmatpush.msra.mxu1 %v232_v17  ;;  %306 = vmatpush.msra.mxu2 %v247_v18  ;;  %v209_v37 = vld [vmem:[#allocation5 + $0x18] sm:$0xff]  ;;  %v208_v40 = vld [vmem:[#allocation5 + $0x10] sm:$0xff]  ;;  %v239_v42 = vld [vmem:[#allocation5 + $0x108] sm:$0xff] }
  0x3a   : > { %260 = vmatpush.msra.mxu0 %v215_v19  ;;  %509 = vmatpush.msra.mxu3 %v215_v19  ;;  %v225_v38 = vld [vmem:[#allocation5 + $0x98] sm:$0xff]  ;;  %v224_v41 = vld [vmem:[#allocation5 + $0x90] sm:$0xff]  ;;  %v207_v43 = vld [vmem:[#allocation5 + $0x8] sm:$0xff] }
  0x3b   : > { %283 = vmatpush.msra.mxu1 %v231_v20  ;;  %307 = vmatpush.msra.mxu2 %v246_v21  ;;  %v223_v44 = vld [vmem:[#allocation5 + $0x88] sm:$0xff]  ;;  %v238_v45 = vld [vmem:[#allocation5 + $0x100] sm:$0xff]  ;;  %v496_v47 = vld [vmem:[%s419_s19 + $0x3] sm:$0xff] }
  0x3c   : > { %261 = vmatpush.msra.mxu0 %v214_v22  ;;  %510 = vmatpush.msra.mxu3 %v214_v22  ;;  %v206_v46 = vld [vmem:[#allocation5] sm:$0xff]  ;;  %v490_v49 = vld [vmem:[%s419_s19 + $0x1] sm:$0xff] }
  0x3d   : > { %284 = vmatpush.msra.mxu1 %v230_v23  ;;  %308 = vmatpush.msra.mxu2 %v245_v24  ;;  %v222_v48 = vld [vmem:[#allocation5 + $0x80] sm:$0xff]  ;;  %v493_v50 = vld [vmem:[%s419_s19 + $0x2] sm:$0xff] }
  0x3e   : > { %262 = vmatpush.msra.mxu0 %v213_v25  ;;  %511 = vmatpush.msra.mxu3 %v213_v25  ;;  %v491_v51 = vld [vmem:[%s419_s19 + $0x9] sm:$0xff] }
  0x3f   : > { %285 = vmatpush.msra.mxu1 %v229_v26  ;;  %309 = vmatpush.msra.mxu2 %v244_v27  ;;  %v497_v52 = vld [vmem:[%s419_s19 + $0xb] sm:$0xff] }
  0x40   : > { %263 = vmatpush.msra.mxu0 %v212_v28  ;;  %512 = vmatpush.msra.mxu3 %v212_v28  ;;  %v494_v53 = vld [vmem:[%s419_s19 + $0xa] sm:$0xff] }
  0x41   : > { %286 = vmatpush.msra.mxu1 %v228_v29  ;;  %310 = vmatpush.msra.mxu2 %v243_v30 }
  0x42   : > { %264 = vmatpush.msra.mxu0 %v211_v31  ;;  %513 = vmatpush.msra.mxu3 %v211_v31 }
  0x43   : > { %287 = vmatpush.msra.mxu1 %v227_v32  ;;  %311 = vmatpush.msra.mxu2 %v242_v33 }
  0x44   : > { %265 = vmatpush.msra.mxu0 %v210_v34  ;;  %514 = vmatpush.msra.mxu3 %v210_v34 }
  0x45   : > { %288 = vmatpush.msra.mxu1 %v226_v35  ;;  %312 = vmatpush.msra.mxu2 %v241_v36 }
  0x46   : > { %266 = vmatpush.msra.mxu0 %v209_v37  ;;  %515 = vmatpush.msra.mxu3 %v209_v37 }
  0x47   : > { %289 = vmatpush.msra.mxu1 %v225_v38  ;;  %313 = vmatpush.msra.mxu2 %v240_v39 }
  0x48   : > { %267 = vmatpush.msra.mxu0 %v208_v40  ;;  %516 = vmatpush.msra.mxu3 %v208_v40 }
  0x49   : > { %290 = vmatpush.msra.mxu1 %v224_v41  ;;  %314 = vmatpush.msra.mxu2 %v239_v42 }
  0x4a   : > { %268 = vmatpush.msra.mxu0 %v207_v43  ;;  %517 = vmatpush.msra.mxu3 %v207_v43 }
  0x4b   : > { %291 = vmatpush.msra.mxu1 %v223_v44  ;;  %315 = vmatpush.msra.mxu2 %v238_v45 }
  0x4c   : > { %269 = vmatpush.msra.mxu0 %v206_v46  ;;  %316 = vmatmul.f32.vlgmr.msra.gmra.mxu2 %v496_v47 }
  0x4d   : > { %292 = vmatpush.msra.mxu1 %v222_v48  ;;  %270 = vmatmul.f32.vlgmr.msra.gmra.mxu0 %v490_v49 }
  0x4e   : > { %293 = vmatmul.f32.vlgmr.msra.gmra.mxu1 %v493_v50  ;;  %518 = vmatpush.msra.mxu3 %v206_v46 }
  0x4f   : > { %273 = vmatmul.f32.vlgmr.msra.gmra.mxu3 %v491_v51 }
  0x54   : > { %319 = vmatmul.f32.gmra.mxu2 %v497_v52 }
  0x56   : > { %296 = vmatmul.f32.gmra.mxu1 %v494_v53 }
  0xca   : > { %v271_v56 = vpop.f32.mrf.mxu0 }
  0xcb   : > { %v294_v55 = vpop.f32.mrf.mxu1 }
  0xcc   : > { %v295_v61 = vadd.f32 %v294_v55, %v271_v56 }
  0xcf   : > { %v317_v59 = vpop.f32.mrf.mxu2 }
  0xd0   : > { %v318_v2 = vadd.f32 %v317_v59, %v295_v61 }
  0xd2   : > { %v274_v63 = vpop.f32.mrf.mxu3  ;;  %v335_v5 = vsel %vm329_vm0, %v318_v2, 0.0 }
  0xd3   : > { %v297_v0 = vpop.f32.mrf.mxu1  ;;  %v344_v8 = vmul.f32 %v335_v5, %v335_v5 }
  0xd4   : > { %v298_v3 = vadd.f32 %v297_v0, %v274_v63 }
  0xd7   : > { %v320_v4 = vpop.f32.mrf.mxu2 }
  0xd8   : > { %v321_v6 = vadd.f32 %v320_v4, %v298_v3 }
  0xda   : > { %v336_v7 = vsel %vm330_vm1, %v321_v6, 0.0 }
  0xdb   : > { %v337_v9 = vadd.f32 %v336_v7, %v335_v5  ;;  %v345_v10 = vmul.f32 %v336_v7, %v336_v7 }
  0xdd   : > { %v338_v11 = vrot.slane %v337_v9, 4  ;;  %v346_v12 = vadd.f32 %v345_v10, %v344_v8 }
  0xdf   : > { %v339_v13 = vadd.f32 %v338_v11, %v337_v9  ;;  %v347_v14 = vrot.slane %v346_v12, 4 }
  0xe1   : > { %v340_v15 = vrot.slane %v339_v13, 2  ;;  %v348_v16 = vadd.f32 %v347_v14, %v346_v12 }
  0xe3   : > { %v341_v17 = vadd.f32 %v340_v15, %v339_v13  ;;  %v349_v18 = vrot.slane %v348_v16, 2 }
  0xe5   : > { %v342_v19 = vrot.slane %v341_v17, 1  ;;  %v350_v20 = vadd.f32 %v349_v18, %v348_v16 }
  0xe7   : > { %v351_v21 = vrot.slane %v350_v20, 1  ;;  %v343_v22 = vadd.f32 %v342_v19, %v341_v17  ;;  %358 = sbr.rel (%p498_p1) target bundleno = 238 (0xee), region = 40 }
  0xe9   : > { %v352_v23 = vadd.f32 %v351_v21, %v350_v20 }
  0xeb   : > { %v354_v24 = vsel %vm353_vm2, %v343_v22, %v352_v23 }
  0xec   : > { %v781_v25 = vmov 0.0  }
  0xed   : > { %359 = vst [vmem:[%s192_s21] sm:$0x3] %v781_v25 }
  0xee PF: > { %s500_s26 = sshll.u32 %s764_s13, 1  ;;  %s376_s8 = sshll.u32 %s192_s21, 4  ;;  %s377_s8 = int_to_ptr.vmem [resolvable:$true] %s376_s8 }
  0xef   : > { %s374_s7 = scalar_lea.hbm %s986_s2, %s500_s26  ;;  %s364_s12 = scalar_lea.sflag [#allocation4], %s917_s17 }
  0xf0   : > { %s378_s20 = sshll.u32 %s374_s7, 4  ;;  %s694_s28 = scalar_lea.hbm %s986_s2, 4  ;;  %s379_s20 = int_to_ptr.hbm [resolvable:$true] %s378_s20 }
  0xf1   : > { %s688_s24 = sshra.s32 %s379_s20, 4  ;;  %s689_s24 = int_to_ptr.hbm [resolvable:$true] %s688_s24 }
  0xf2   : > { %s690_s25 = scalar_lea.hbm %s689_s24, 2  ;;  %p695_p11 = scmp.lt.s32.totalorder %s689_s24, %s986_s2 }
  0xf3   : > { %p691_p4 = scmp.ne.s32.totalorder %s689_s24, %s690_s25  ;;  %p696_p12 = scmp.lt.s32.totalorder %s694_s28, %s690_s25 }
  0xf4   : > { %v360_v26 = vld [vmem:[%s192_s21] sm:$0x3] }
  0xf5   : > { %v361_v27 = vadd.f32 %v360_v26, %v354_v24  ;;  %p692_p8 = pnand %p691_p4, %p886_p0  ;;  %p697_p13 = por %p696_p12, %p695_p11 }
  0xf7   : > { %362 = vst [vmem:[%s192_s21] sm:$0x3] %v361_v27  ;;  %p693_p10 = pneg %p692_p8 }
  0xf9   : > { %p698_p3 = pnand %p697_p13, %p693_p10 }
  0xfb   : > { %701 = shalt.err (!%p698_p3)
}
  0xfc   : > { %528 = dma.vmem_to_hbm [thread:$0]  (%p886_p0), %s377_s8, 32, %s379_s20, %s364_s12  }
  0xfd PF: > { %p545_p5 = scmp.ge.s32.totalorder %s776_s16, 2  ;;  %s390_s17 = sand.u32 1, %s748_s9  }
  0xfe   : > { %s391_s23 = scalar_lea.sflag [#allocation4], %s390_s17 }
  0xff   : > { %p539_p7 = pnand %p545_p5, %p856_p6 }
 0x101   : > { %p540_p9 = pneg %p539_p7 }
 0x103   : > { %743 = dma.done.wait (%p540_p9), %s391_s23, 32  }
 0x104   : > { %745 = vsyncadd (%p540_p9), %s391_s23, 4294967264  ;;  %s19_s16 = sadd.s32 1, %s776_s16   ;;  %s1003_s12 = sld [smem:[#allocation11_spill]] }
 0x105   : > { %p16_p2 = scmp.ge.s32.totalorder %s19_s16, 8   ;;  %s1004_s14 = sld [smem:[#allocation12_spill]] }
 0x106   : > { %s1005_s9 = smov %s752_s10  ;;  %s1006_s10 = smov %s756_s11 }
 0x107   : > { %s1007_s11 = smov %s905_s29  ;;  %s1008_s13 = smov %s772_s15 }
 0x108   : > { %s1009_s15 = smov %s1015_s4  ;;  %18 = sbr.rel (!%p16_p2) target bundleno = 10 (0xa), region = 84 }
 0x10d   :  { %397 = vsyncpa [#allocation3], 1 }
 0x10e   :  { %399 = vsyncpa [#allocation3 + $0x1], 1 }
 0x10f   :  { %400 = vsyncpa [#allocation6], 1 }
 0x110   :  { %401 = vsyncpa [#allocation4], 1 }
 0x111   :  { %403 = vsyncpa [#allocation4 + $0x1], 1 }

</bundles_post_ra>
